<compile_context>
chip_gen: v6e
topology: v6e:2x2x1
jax: 0.10.0
libtpu: 0.0.40
codegen_flags: <defaults>
</compile_context>

<pallas_src>
import functools

import jax
import jax.numpy as jnp
from jax.experimental import pallas as pl
from jax.experimental.pallas import tpu as pltpu


def _ffn_kernel(x_ref, g_ref, bta_ref, w1_ref, b1_ref, w2_ref, b2_ref,
                o_ref, *, eps):
    # x tile: (TM, D) in its native HBM dtype; compute in f32.
    x = x_ref[...].astype(jnp.float32)

    # LayerNorm over the feature axis (biased variance, like nn.LayerNorm).
    mu = jnp.mean(x, axis=-1, keepdims=True)
    xc = x - mu
    var = jnp.mean(xc * xc, axis=-1, keepdims=True)
    xhat = xc * jax.lax.rsqrt(var + eps)
    y = xhat * g_ref[...].astype(jnp.float32) + bta_ref[...].astype(jnp.float32)

    # fc1 + ReLU (MXU matmul, f32 accumulation).
    h = jnp.dot(y.astype(w1_ref.dtype), w1_ref[...],
                preferred_element_type=jnp.float32)
    h = jnp.maximum(h + b1_ref[...].astype(jnp.float32), 0.0)

    # fc2.
    z = jnp.dot(h.astype(w2_ref.dtype), w2_ref[...],
                preferred_element_type=jnp.float32)
    z = z + b2_ref[...].astype(jnp.float32)

    # TODO(synk): dropout is stochastic at train time; identity here (eval).
    o_ref[...] = (z + x).astype(o_ref.dtype)


def position_wise_fc(x, gamma, beta, w1, b1, w2, b2, *, eps=1e-5, tm=256):
    """Position-wise FFN sublayer forward: (N, T, D) -> (N, T, D)."""
    N, T, D = x.shape
    Di = w1.shape[1]
    rows = N * T

    x2 = x.reshape(rows, D)                     # no dtype cast, no padding
    tm = rows if rows <= tm else tm             # big tiles; (8,128) rule holds
    grid = (pl.cdiv(rows, tm),)

    gamma2 = gamma.reshape(1, D)
    beta2 = beta.reshape(1, D)
    b1_2 = b1.reshape(1, Di)
    b2_2 = b2.reshape(1, D)

    out = pl.pallas_call(
        functools.partial(_ffn_kernel, eps=eps),
        out_shape=jax.ShapeDtypeStruct((rows, D), x.dtype),
        grid=grid,
        in_specs=[
            pl.BlockSpec((tm, D), lambda i: (i, 0)),     # x tile (streamed)
            pl.BlockSpec((1, D), lambda i: (0, 0)),      # gamma   (resident)
            pl.BlockSpec((1, D), lambda i: (0, 0)),      # beta    (resident)
            pl.BlockSpec((D, Di), lambda i: (0, 0)),     # W1      (resident)
            pl.BlockSpec((1, Di), lambda i: (0, 0)),     # b1      (resident)
            pl.BlockSpec((Di, D), lambda i: (0, 0)),     # W2      (resident)
            pl.BlockSpec((1, D), lambda i: (0, 0)),      # b2      (resident)
        ],
        out_specs=pl.BlockSpec((tm, D), lambda i: (i, 0)),
        compiler_params=pltpu.CompilerParams(
            dimension_semantics=("parallel",),           # megacore on v7x
            vmem_limit_bytes=32 * 1024 * 1024,           # safe on v5e/v6e/v7x
        ),
    )(x2, gamma2, beta2, w1, b1_2, w2, b2_2)

    return out.reshape(N, T, D)


def _reference(x, gamma, beta, w1, b1, w2, b2, eps=1e-5):
    """Pure-JAX reference mirroring the PyTorch module in eval mode."""
    xf = x.astype(jnp.float32)
    mu = jnp.mean(xf, axis=-1, keepdims=True)
    var = jnp.mean((xf - mu) ** 2, axis=-1, keepdims=True)
    y = (xf - mu) / jnp.sqrt(var + eps) * gamma + beta
    h = jnp.maximum(y @ w1.astype(jnp.float32) + b1, 0.0)
    z = h @ w2.astype(jnp.float32) + b2
    return (z + xf).astype(x.dtype)


if __name__ == "__main__":
    key = jax.random.PRNGKey(0)
    k1, k2, k3, k4, k5, k6, k7 = jax.random.split(key, 7)

    N, T, d_model, d_inner = 2, 8, 32, 64

    x = jax.random.normal(k1, (N, T, d_model), dtype=jnp.float32)
    gamma = 1.0 + 0.1 * jax.random.normal(k2, (d_model,), dtype=jnp.float32)
    beta = 0.1 * jax.random.normal(k3, (d_model,), dtype=jnp.float32)
    w1 = jax.random.normal(k4, (d_model, d_inner), dtype=jnp.float32) / jnp.sqrt(d_model)
    b1 = 0.1 * jax.random.normal(k5, (d_inner,), dtype=jnp.float32)
    w2 = jax.random.normal(k6, (d_inner, d_model), dtype=jnp.float32) / jnp.sqrt(d_inner)
    b2 = 0.1 * jax.random.normal(k7, (d_model,), dtype=jnp.float32)

    out = position_wise_fc(x, gamma, beta, w1, b1, w2, b2)
    out = jax.block_until_ready(out)

    ref = _reference(x, gamma, beta, w1, b1, w2, b2)
    assert out.shape == (N, T, d_model), out.shape
    assert jnp.allclose(out, ref, rtol=1e-4, atol=1e-4), (
        float(jnp.max(jnp.abs(out - ref))))

    print("KERNEL_OK")
</pallas_src>

<mosaic_0001>
module attributes {stable_mosaic.version = 11 : i64} {
  func.func @_ffn_kernel(%arg0: i32, %arg1: memref<16x32xf32, #tpu.memory_space<vmem>>, %arg2: memref<1x32xf32, #tpu.memory_space<vmem>>, %arg3: memref<1x32xf32, #tpu.memory_space<vmem>>, %arg4: memref<32x64xf32, #tpu.memory_space<vmem>>, %arg5: memref<1x64xf32, #tpu.memory_space<vmem>>, %arg6: memref<64x32xf32, #tpu.memory_space<vmem>>, %arg7: memref<1x32xf32, #tpu.memory_space<vmem>>, %arg8: memref<16x32xf32, #tpu.memory_space<vmem>>) attributes {dimension_semantics = [#tpu.dimension_semantics<parallel>], iteration_bounds = array<i64: 1>, scalar_prefetch = 0 : i64, scratch_operands = 0 : i64, tpu.core_type = #tpu.core_type<tc>, window_params = [{transform_indices = @transform_0, window_bounds = array<i64: 16, 32>}, {pipeline_mode = #tpu.pipeline_mode<synchronous>, transform_indices = @transform_1, window_bounds = array<i64: 1, 32>}, {pipeline_mode = #tpu.pipeline_mode<synchronous>, transform_indices = @transform_2, window_bounds = array<i64: 1, 32>}, {pipeline_mode = #tpu.pipeline_mode<synchronous>, transform_indices = @transform_3, window_bounds = array<i64: 32, 64>}, {pipeline_mode = #tpu.pipeline_mode<synchronous>, transform_indices = @transform_4, window_bounds = array<i64: 1, 64>}, {pipeline_mode = #tpu.pipeline_mode<synchronous>, transform_indices = @transform_5, window_bounds = array<i64: 64, 32>}, {pipeline_mode = #tpu.pipeline_mode<synchronous>, transform_indices = @transform_6, window_bounds = array<i64: 1, 32>}, {transform_indices = @transform_7, window_bounds = array<i64: 16, 32>}]} {
    %c0 = arith.constant 0 : index
    %c0_0 = arith.constant 0 : index
    %0 = vector.load %arg1[%c0, %c0_0] : memref<16x32xf32, #tpu.memory_space<vmem>>, vector<16x32xf32>
    %cst = arith.constant dense<0.000000e+00> : vector<16xf32>
    %1 = vector.multi_reduction <add>, %0, %cst [1] : vector<16x32xf32> to vector<16xf32>
    %2 = vector.shape_cast %1 : vector<16xf32> to vector<16x1xf32>
    %cst_1 = arith.constant 3.200000e+01 : f32
    %3 = vector.broadcast %cst_1 : f32 to vector<16x1xf32>
    %4 = arith.divf %2, %3 : vector<16x1xf32>
    %5 = vector.broadcast %4 : vector<16x1xf32> to vector<16x32xf32>
    %6 = arith.subf %0, %5 : vector<16x32xf32>
    %7 = arith.mulf %6, %6 : vector<16x32xf32>
    %cst_2 = arith.constant dense<0.000000e+00> : vector<16xf32>
    %8 = vector.multi_reduction <add>, %7, %cst_2 [1] : vector<16x32xf32> to vector<16xf32>
    %9 = vector.shape_cast %8 : vector<16xf32> to vector<16x1xf32>
    %cst_3 = arith.constant 3.200000e+01 : f32
    %10 = vector.broadcast %cst_3 : f32 to vector<16x1xf32>
    %11 = arith.divf %9, %10 : vector<16x1xf32>
    %cst_4 = arith.constant 9.99999974E-6 : f32
    %12 = vector.broadcast %cst_4 : f32 to vector<16x1xf32>
    %13 = arith.addf %11, %12 : vector<16x1xf32>
    %14 = math.rsqrt %13 : vector<16x1xf32>
    %15 = vector.broadcast %14 : vector<16x1xf32> to vector<16x32xf32>
    %16 = arith.mulf %6, %15 : vector<16x32xf32>
    %c0_5 = arith.constant 0 : index
    %c0_6 = arith.constant 0 : index
    %17 = vector.load %arg2[%c0_5, %c0_6] : memref<1x32xf32, #tpu.memory_space<vmem>>, vector<1x32xf32>
    %18 = vector.broadcast %17 : vector<1x32xf32> to vector<16x32xf32>
    %19 = arith.mulf %16, %18 : vector<16x32xf32>
    %c0_7 = arith.constant 0 : index
    %c0_8 = arith.constant 0 : index
    %20 = vector.load %arg3[%c0_7, %c0_8] : memref<1x32xf32, #tpu.memory_space<vmem>>, vector<1x32xf32>
    %21 = vector.broadcast %20 : vector<1x32xf32> to vector<16x32xf32>
    %22 = arith.addf %19, %21 : vector<16x32xf32>
    %c0_9 = arith.constant 0 : index
    %c0_10 = arith.constant 0 : index
    %23 = vector.load %arg4[%c0_9, %c0_10] : memref<32x64xf32, #tpu.memory_space<vmem>>, vector<32x64xf32>
    %cst_11 = arith.constant dense<0.000000e+00> : vector<16x64xf32>
    %24 = tpu.matmul %22, %23, %cst_11 {dimension_numbers = #tpu.dot_dimension_numbers<[1], [0], [0], [1], [0, 0, 1, 1], [], []>} : vector<16x32xf32>, vector<32x64xf32>, vector<16x64xf32> -> vector<16x64xf32>
    %c0_12 = arith.constant 0 : index
    %c0_13 = arith.constant 0 : index
    %25 = vector.load %arg5[%c0_12, %c0_13] : memref<1x64xf32, #tpu.memory_space<vmem>>, vector<1x64xf32>
    %26 = vector.broadcast %25 : vector<1x64xf32> to vector<16x64xf32>
    %27 = arith.addf %24, %26 : vector<16x64xf32>
    %cst_14 = arith.constant 0.000000e+00 : f32
    %28 = vector.broadcast %cst_14 : f32 to vector<16x64xf32>
    %29 = arith.maximumf %27, %28 : vector<16x64xf32>
    %c0_15 = arith.constant 0 : index
    %c0_16 = arith.constant 0 : index
    %30 = vector.load %arg6[%c0_15, %c0_16] : memref<64x32xf32, #tpu.memory_space<vmem>>, vector<64x32xf32>
    %cst_17 = arith.constant dense<0.000000e+00> : vector<16x32xf32>
    %31 = tpu.matmul %29, %30, %cst_17 {dimension_numbers = #tpu.dot_dimension_numbers<[1], [0], [0], [1], [0, 0, 1, 1], [], []>} : vector<16x64xf32>, vector<64x32xf32>, vector<16x32xf32> -> vector<16x32xf32>
    %c0_18 = arith.constant 0 : index
    %c0_19 = arith.constant 0 : index
    %32 = vector.load %arg7[%c0_18, %c0_19] : memref<1x32xf32, #tpu.memory_space<vmem>>, vector<1x32xf32>
    %33 = vector.broadcast %32 : vector<1x32xf32> to vector<16x32xf32>
    %34 = arith.addf %31, %33 : vector<16x32xf32>
    %35 = arith.addf %34, %0 : vector<16x32xf32>
    %c0_20 = arith.constant 0 : index
    %c0_21 = arith.constant 0 : index
    %36 = vector.load %arg8[%c0_20, %c0_21] : memref<16x32xf32, #tpu.memory_space<vmem>>, vector<16x32xf32>
    tpu.vector_store %arg8[%c0_20, %c0_21], %35 {strides = array<i32>} : memref<16x32xf32, #tpu.memory_space<vmem>>, vector<16x32xf32>,
    return
  }
  func.func @transform_0(%arg0: i32) -> (i32, i32) {
    %c0_i32 = arith.constant 0 : i32
    %c0_i32_0 = arith.constant 0 : i32
    return %arg0, %c0_i32 : i32, i32
  }
  func.func @transform_1(%arg0: i32) -> (i32, i32) {
    %c0_i32 = arith.constant 0 : i32
    %c0_i32_0 = arith.constant 0 : i32
    %c0_i32_1 = arith.constant 0 : i32
    return %c0_i32, %c0_i32_0 : i32, i32
  }
  func.func @transform_2(%arg0: i32) -> (i32, i32) {
    %c0_i32 = arith.constant 0 : i32
    %c0_i32_0 = arith.constant 0 : i32
    %c0_i32_1 = arith.constant 0 : i32
    return %c0_i32, %c0_i32_0 : i32, i32
  }
  func.func @transform_3(%arg0: i32) -> (i32, i32) {
    %c0_i32 = arith.constant 0 : i32
    %c0_i32_0 = arith.constant 0 : i32
    %c0_i32_1 = arith.constant 0 : i32
    return %c0_i32, %c0_i32_0 : i32, i32
  }
  func.func @transform_4(%arg0: i32) -> (i32, i32) {
    %c0_i32 = arith.constant 0 : i32
    %c0_i32_0 = arith.constant 0 : i32
    %c0_i32_1 = arith.constant 0 : i32
    return %c0_i32, %c0_i32_0 : i32, i32
  }
  func.func @transform_5(%arg0: i32) -> (i32, i32) {
    %c0_i32 = arith.constant 0 : i32
    %c0_i32_0 = arith.constant 0 : i32
    %c0_i32_1 = arith.constant 0 : i32
    return %c0_i32, %c0_i32_0 : i32, i32
  }
  func.func @transform_6(%arg0: i32) -> (i32, i32) {
    %c0_i32 = arith.constant 0 : i32
    %c0_i32_0 = arith.constant 0 : i32
    %c0_i32_1 = arith.constant 0 : i32
    return %c0_i32, %c0_i32_0 : i32, i32
  }
  func.func @transform_7(%arg0: i32) -> (i32, i32) {
    %c0_i32 = arith.constant 0 : i32
    %c0_i32_0 = arith.constant 0 : i32
    return %arg0, %c0_i32 : i32, i32
  }
}

</mosaic_0001>

<bundles_post_ra>
// kernel: tpu_custom_call.1
= control target key start
LH: loop header
LB: loop body
LE: loop exit
PB: predicated region body
PF: predicated region fallthrough
CT: control target
= control target key end

     0   :  { %vm29_vm0 = vcmask 261120   ;;  %s487_s0 = inlined_call_operand.vmem [shape: f32[16,32], index: 0, kind: input, shape index: {}]   ;;  %s488_s1 = inlined_call_operand.vmem [shape: f32[1,32], index: 1, kind: input, shape index: {}]   ;;  %s489_s2 = inlined_call_operand.vmem [shape: f32[1,32], index: 2, kind: input, shape index: {}]   ;;  %s490_s3 = inlined_call_operand.vmem [shape: f32[32,64], index: 3, kind: input, shape index: {}]   ;;  %s491_s4 = inlined_call_operand.vmem [shape: f32[1,64], index: 4, kind: input, shape index: {}]   ;;  %s492_s5 = inlined_call_operand.vmem [shape: f32[64,32], index: 5, kind: input, shape index: {}]   ;;  %s493_s6 = inlined_call_operand.vmem [shape: f32[1,32], index: 6, kind: input, shape index: {}]   ;;  %s494_s7 = inlined_call_operand.hbm [shape: f32[16,32], index: 7, kind: output, shape index: {}]  }
   0x1   :  { %v415_v0 = vld [vmem:[%s487_s0] sm:$0xff]  ;;  %v420_v1 = vld [vmem:[%s487_s0 + $0x8] sm:$0xff] }
   0x2   :  { %12 = vsyncpa [#allocation3], 0  ;;  %v30_v2 = vsel %vm29_vm0, %v415_v0, 0.0  ;;  %v33_v3 = vsel %vm29_vm0, %v420_v1, 0.0  ;;  %v78_v14 = vld [vmem:[%s490_s3 + $0x18] sm:$0xff]  ;;  %v77_v15 = vld [vmem:[%s490_s3 + $0x10] sm:$0xff] }
   0x3   :  { %31 = vadd.xlane.f32.xlu0 %v30_v2  ;;  %310 = vmatprep.subr.mxu0 %v78_v14  ;;  %v76_v16 = vld [vmem:[%s490_s3 + $0x8] sm:$0xff]  ;;  %v75_v17 = vld [vmem:[%s490_s3] sm:$0xff]  ;;  %v176_v18 = vld [vmem:[%s492_s5 + $0x38] sm:$0xff]  ;;  %vm184_vm1 = vcmask 523264  }
   0x4   :  { %311 = vmatpush3.msra.mxu0 %v78_v14  ;;  %v175_v19 = vld [vmem:[%s492_s5 + $0x30] sm:$0xff]  ;;  %321 = vmatprep.subr.mxu1 %v176_v18  ;;  %v174_v20 = vld [vmem:[%s492_s5 + $0x28] sm:$0xff]  ;;  %v173_v21 = vld [vmem:[%s492_s5 + $0x20] sm:$0xff] }
   0x5   :  { %312 = vmatprep.subr.mxu0 %v77_v15  ;;  %322 = vmatpush3.msra.mxu1 %v176_v18  ;;  %v286_v29 = vld [vmem:[%s488_s1] ss:$0 sm:$0xff]  ;;  %v172_v38 = vld [vmem:[%s492_s5 + $0x18] sm:$0xff]  ;;  %v171_v39 = vld [vmem:[%s492_s5 + $0x10] sm:$0xff] }
   0x6   :  { %313 = vmatpush3.msra.mxu0 %v77_v15  ;;  %323 = vmatprep.subr.mxu1 %v175_v19  ;;  %v287_v31 = vld [vmem:[%s489_s2] ss:$0 sm:$0xff]  ;;  %v170_v40 = vld [vmem:[%s492_s5 + $0x8] sm:$0xff] }
   0x7   :  { %34 = vadd.xlane.f32.xlu0 %v33_v3  ;;  %314 = vmatprep.subr.mxu0 %v76_v16  ;;  %v169_v41 = vld [vmem:[%s492_s5] sm:$0xff]  ;;  %s369_s5 = smov [#allocation2]  }
   0x8   :  { %315 = vmatpush3.msra.mxu0 %v76_v16  ;;  %324 = vmatpush3.msra.mxu1 %v175_v19  ;;  %v288_v42 = vld [vmem:[%s491_s4] ss:$0 sm:$0xff]  ;;  %s275_s9 = sshll.u32 %s369_s5, 4  ;;  %s276_s9 = int_to_ptr.vmem [resolvable:$true] %s275_s9 }
   0x9   :  { %316 = vmatprep.subr.mxu0 %v75_v17  ;;  %325 = vmatprep.subr.mxu1 %v174_v20  ;;  %v291_v49 = vld [vmem:[%s493_s6] ss:$0 sm:$0xff]  ;;  %s347_s4 = scalar_lea.vmem %s276_s9, 256  ;;  %p352_p1 = scmp.lt.s32.totalorder %s276_s9, %s276_s9 }
   0xa   :  { %317 = vmatpush3.msra.mxu0 %v75_v17  ;;  %326 = vmatpush3.msra.mxu1 %v174_v20  ;;  %p348_p0 = scmp.ne.s32.totalorder %s276_s9, %s347_s4  ;;  %p353_p2 = scmp.lt.s32.totalorder %s347_s4, %s347_s4 }
   0xb   :  { %327 = vmatprep.subr.mxu1 %v173_v21 }
   0xc   :  { %328 = vmatpush3.msra.mxu1 %v173_v21  ;;  %p354_p3 = por %p353_p2, %p352_p1 }
   0xd   :  { %329 = vmatprep.subr.mxu1 %v172_v38 }
   0xe   :  { %330 = vmatpush3.msra.mxu1 %v172_v38  ;;  %p355_p4 = pnand %p354_p3, %p348_p0 }
   0xf   :  { %331 = vmatprep.subr.mxu1 %v171_v39 }
  0x10   :  { %332 = vmatpush3.msra.mxu1 %v171_v39 }
  0x11   :  { %333 = vmatprep.subr.mxu1 %v170_v40 }
  0x12   :  { %334 = vmatpush3.msra.mxu1 %v170_v40 }
  0x13   :  { %335 = vmatprep.subr.mxu1 %v169_v41 }
  0x14   :  { %336 = vmatpush3.msra.mxu1 %v169_v41 }
  0x8c   :  { %v32_v4 = vpop.xlane.xlu0 %31 }
  0x8d   :  { %v37_v5 = vmul.f32 0.03125, %v32_v4 }
  0x8f   :  { %v39_v6 = vsub.f32 %v415_v0, %v37_v5 }
  0x90   :  { %v35_v7 = vpop.xlane.xlu0 %34 }
  0x91   :  { %v38_v8 = vmul.f32 0.03125, %v35_v7  ;;  %v41_v9 = vmul.f32 %v39_v6, %v39_v6 }
  0x93   :  { %v40_v10 = vsub.f32 %v420_v1, %v38_v8  ;;  %v43_v11 = vsel %vm29_vm0, %v41_v9, 0.0 }
  0x94   :  { %44 = vadd.xlane.f32.xlu1 %v43_v11 }
  0x95   :  { %v42_v12 = vmul.f32 %v40_v10, %v40_v10 }
  0x97   :  { %v46_v13 = vsel %vm29_vm0, %v42_v12, 0.0 }
  0x98   :  { %47 = vadd.xlane.f32.xlu1 %v46_v13 }
 0x11d   :  { %v45_v22 = vpop.xlane.xlu1 %44 }
 0x11e   :  { %v49_v23 = vmul.f32 0.03125, %v45_v22 }
 0x120   :  { %v51_v24 = vadd.f32 1e-05, %v49_v23 }
 0x121   :  { %v48_v25 = vpop.xlane.xlu1 %47 }
 0x122   :  { %343 = vrsqrt.f32 %v51_v24  ;;  %v50_v26 = vmul.f32 0.03125, %v48_v25 }
 0x124   :  { %v52_v27 = vadd.f32 1e-05, %v50_v26 }
 0x126   :  { %345 = vrsqrt.f32 %v52_v27 }
 0x12f   :  { %v344_v28 = vpop.eup %343 }
 0x130   :  { %v55_v30 = vmul.f32 %v344_v28, %v39_v6 }
 0x132   :  { %v64_v32 = vmul.f32 %v286_v29, %v55_v30 }
 0x133   :  { %v346_v33 = vpop.eup %345 }
 0x134   :  { %v56_v34 = vmul.f32 %v346_v33, %v40_v10  ;;  %v73_v35 = vadd.f32 %v287_v31, %v64_v32 }
 0x136   :  { %v65_v36 = vmul.f32 %v286_v29, %v56_v34  ;;  %318 = vmatprep.mubr.msk.f32.mxu0 %vm29_vm0, %v73_v35 }
 0x138   :  { %v74_v37 = vadd.f32 %v287_v31, %v65_v36 }
 0x13a   :  { %319 = vmatmul.mubr.msk.f32.vlgmr.msra.gmra.mxu0 %vm29_vm0, %v74_v37 }
 0x1fa   :  { %v320_v43 = vpop.f32.mrf.mxu0 }
 0x1fb   :  { %v164_v44 = vadd.f32 %v320_v43, %v288_v42 }
 0x1fc   :  { %v158_v45 = vpop.f32.mrf.mxu0 }
 0x1fd   :  { %v159_v46 = vadd.f32 %v288_v42, %v158_v45  ;;  %v168_v48 = vmax.f32 %v164_v44, 0.0 }
 0x1ff   :  { %v167_v47 = vmax.f32 %v159_v46, 0.0 }
 0x201   :  { %337 = vmatprep.mubr.msk.f32.mxu1 %vm184_vm1, %v167_v47 }
 0x202   :  { %338 = vmatmul.mubr.msk.f32.vlgmr.msra.gmra.mxu1 %vm184_vm1, %v168_v48 }
 0x2c2   :  { %v339_v50 = vpop.f32.mrf.mxu1 }
 0x2c3   :  { %v263_v51 = vadd.f32 %v339_v50, %v291_v49 }
 0x2c4   :  { %v257_v52 = vpop.f32.mrf.mxu1 }
 0x2c5   :  { %v267_v53 = vadd.f32 %v263_v51, %v420_v1  ;;  %v258_v54 = vadd.f32 %v291_v49, %v257_v52 }
 0x2c7   :  { %269 = vst.msk [vmem:[#allocation2 + $0x8] sm:$0xff] %vm29_vm0, %v267_v53  ;;  %v266_v55 = vadd.f32 %v258_v54, %v415_v0 }
 0x2c9   :  { %268 = vst.msk [vmem:[#allocation2] sm:$0xff] %vm29_vm0, %v266_v55 }
 0x2ca   :  { %358 = shalt.err (!%p355_p4)
}
 0x2cb   :  { %s370_s6 = smov 128   ;;  %s371_s10 = smov 8  }
 0x2cc   :  { %281 = dma.vmem_to_hbm [thread:$0]  %s276_s9, 256, %s494_s7, [#allocation3], %s370_s6, %s370_s6, %s371_s10  }
 0x2cd   :  { %367 = dma.done.wait [#allocation3], 256  }
 0x2ce   :  { %368 = vsyncadd [#allocation3], 4294967040 }
 0x2cf   :  { %285 = vsyncpa [#allocation3], 1 }

</bundles_post_ra>
